<compile_context>
chip_gen: v7x
topology: tpu7x:2x2x1
jax: 0.10.0
libtpu: 0.0.40
codegen_flags: <defaults>
</compile_context>

<pallas_src>
import functools
import math

import jax
import jax.numpy as jnp
from jax import lax
from jax.experimental import pallas as pl
from jax.experimental.pallas import tpu as pltpu  # noqa: F401  (TPU backend)

# --- small BERT config -------------------------------------------------------
B, L, H = 2, 8, 32          # batch, seq len, hidden size
NH = 4                      # attention heads
HD = H // NH                # head dim
I = 4 * H                   # intermediate size (128)
LN_EPS = 1e-12
NEG = -10000.0
NUM_VECS = 8                # rows of the packed small-parameter table
VEC_W = 128                 # = max(3*H, I, H) rounded to a full lane width


def _layernorm(x, gamma, beta):
    mu = jnp.mean(x, axis=-1, keepdims=True)
    var = jnp.mean((x - mu) ** 2, axis=-1, keepdims=True)
    return (x - mu) * lax.rsqrt(var + LN_EPS) * gamma + beta


def _gelu(x):
    # BERT's exact (erf-based) GELU.
    return 0.5 * x * (1.0 + lax.erf(x / math.sqrt(2.0)))


def bert_layer_kernel(x_ref, mask_ref, wqkv_ref, wao_ref, wi_ref, wo_ref,
                      vec_ref, out_ref, *, diagonal_mask):
    """Whole layer, all batch elements, fused in one VMEM-resident step."""
    x = x_ref[...]                        # (B*L, H)
    mask = mask_ref[...]                  # (B, L)  1 = keep, 0 = pad
    vecs = vec_ref[...]                   # (NUM_VECS, VEC_W) packed params

    bqkv = vecs[0:1, :3 * H]              # (1, 3H)
    bao  = vecs[1:2, :H]
    g1   = vecs[2:3, :H]
    b1   = vecs[3:4, :H]
    bi   = vecs[4:5, :I]
    bo   = vecs[5:6, :H]
    g2   = vecs[6:7, :H]
    b2   = vecs[7:8, :H]

    # --- fused QKV projection: one (B*L,H) x (H,3H) MXU push ----------------
    qkv = jnp.dot(x, wqkv_ref[...]) + bqkv            # (B*L, 3H)

    # --- additive attention bias built in-kernel from the (B, L) mask -------
    m = mask[:, None, :]                               # (B, 1, L)
    if diagonal_mask:
        r = lax.broadcasted_iota(jnp.int32, (L, L), 0)
        c = lax.broadcasted_iota(jnp.int32, (L, L), 1)
        m = m * (c <= r).astype(jnp.float32)[None]     # (B, L, L)
    bias = (1.0 - m) * NEG

    # --- per-head scaled dot-product attention, batched over B --------------
    scale = 1.0 / math.sqrt(HD)
    ctx_heads = []
    for h in range(NH):                                # static unroll (NH=4)
        qh = qkv[:, h * HD:(h + 1) * HD].reshape(B, L, HD)
        kh = qkv[:, H + h * HD:H + (h + 1) * HD].reshape(B, L, HD)
        vh = qkv[:, 2 * H + h * HD:2 * H + (h + 1) * HD].reshape(B, L, HD)
        s = jnp.einsum("bqd,bkd->bqk", qh, kh) * scale + bias
        s = s - jnp.max(s, axis=-1, keepdims=True)
        p = jnp.exp(s)
        p = p * pl.reciprocal(jnp.sum(p, axis=-1, keepdims=True), approx=True)
        ctx_heads.append(jnp.einsum("bqk,bkd->bqd", p, vh))
    ctx = jnp.concatenate(ctx_heads, axis=-1).reshape(B * L, H)

    # --- BertSelfOutput: dense + residual + LayerNorm ------------------------
    attn = jnp.dot(ctx, wao_ref[...]) + bao
    attn = _layernorm(attn + x, g1, b1)

    # --- BertIntermediate (hidden_intermediate) + BertOutput -----------------
    inter = _gelu(jnp.dot(attn, wi_ref[...]) + bi)
    y = jnp.dot(inter, wo_ref[...]) + bo
    y = _layernorm(y + attn, g2, b2)

    out_ref[...] = y.astype(out_ref.dtype)


def bert_layer_untied(hidden_states, attention_mask, params,
                      diagonal_mask=False, temporal_tokens=None):
    """Pallas implementation of BertLayerUntied.forward (eval mode)."""
    assert temporal_tokens is None  # TODO(synk): temporal/relative bias path
    Bn, Ln, Hn = hidden_states.shape
    assert (Bn, Ln, Hn) == (B, L, H)

    # Pack the 12 tiny bias / LayerNorm vectors into one (8, 128) table so the
    # kernel sees a single ref (one DMA) instead of 12 tiny transfers.
    def row(v):
        v = v.reshape(-1)
        return jnp.pad(v, (0, VEC_W - v.size))

    vecs = jnp.stack([
        row(params["bqkv"]), row(params["bao"]), row(params["g1"]),
        row(params["b1"]), row(params["bi"]), row(params["bo"]),
        row(params["g2"]), row(params["b2"])])                 # (8, 128)

    x2d = hidden_states.reshape(Bn * Ln, Hn)
    mask = attention_mask.astype(jnp.float32)

    out = pl.pallas_call(
        functools.partial(bert_layer_kernel, diagonal_mask=diagonal_mask),
        out_shape=jax.ShapeDtypeStruct((Bn * Ln, Hn), jnp.float32),
        # No grid: the whole problem (B*L = 16 rows) fits in VMEM, so every
        # input/output defaults to a single full-array block -> one invocation,
        # no per-grid-step or per-batch DMA overhead.
    )(x2d, mask, params["wqkv"], params["wao"], params["wi"], params["wo"],
      vecs)
    return out.reshape(Bn, Ln, Hn)


# --- pure-JAX reference (mirrors the PyTorch math) ---------------------------
def ref_bert_layer(x, attention_mask, P, diagonal_mask=False):
    Bn, Ln, Hn = x.shape
    m = jnp.broadcast_to(attention_mask[:, None, :].astype(jnp.float32),
                         (Bn, Ln, Ln))
    if diagonal_mask:
        m = m * jnp.tril(jnp.ones((Ln, Ln), jnp.float32))
    bias = (1.0 - m) * NEG

    qkv = x @ P["wqkv"] + P["bqkv"]
    q, k, v = jnp.split(qkv, 3, axis=-1)

    def heads(t):
        return t.reshape(Bn, Ln, NH, HD).transpose(0, 2, 1, 3)

    q, k, v = heads(q), heads(k), heads(v)
    s = jnp.einsum("bhqd,bhkd->bhqk", q, k) / math.sqrt(HD) + bias[:, None]
    p = jax.nn.softmax(s, axis=-1)
    ctx = (jnp.einsum("bhqk,bhkd->bhqd", p, v)
           .transpose(0, 2, 1, 3).reshape(Bn, Ln, Hn))

    attn = _layernorm(ctx @ P["wao"] + P["bao"] + x, P["g1"], P["b1"])
    inter = _gelu(attn @ P["wi"] + P["bi"])
    return _layernorm(inter @ P["wo"] + P["bo"] + attn, P["g2"], P["b2"])


def make_params(key):
    """Deterministic synthetic init. Linear weights stored as (in, out),
    i.e. already transposed relative to torch.nn.Linear's (out, in)."""
    ks = jax.random.split(key, 14)
    std = 0.02
    return {
        "wqkv": jax.random.normal(ks[0], (H, 3 * H), jnp.float32) * std,
        "bqkv": jax.random.normal(ks[1], (3 * H,), jnp.float32) * std,
        "wao": jax.random.normal(ks[2], (H, H), jnp.float32) * std,
        "bao": jax.random.normal(ks[3], (H,), jnp.float32) * std,
        "wi": jax.random.normal(ks[4], (H, I), jnp.float32) * std,
        "bi": jax.random.normal(ks[5], (I,), jnp.float32) * std,
        "wo": jax.random.normal(ks[6], (I, H), jnp.float32) * std,
        "bo": jax.random.normal(ks[7], (H,), jnp.float32) * std,
        "g1": 1.0 + jax.random.normal(ks[8], (H,), jnp.float32) * std,
        "b1": jax.random.normal(ks[9], (H,), jnp.float32) * std,
        "g2": 1.0 + jax.random.normal(ks[10], (H,), jnp.float32) * std,
        "b2": jax.random.normal(ks[11], (H,), jnp.float32) * std,
    }


if __name__ == "__main__":
    key = jax.random.PRNGKey(0)
    k_x, k_p = jax.random.split(key)

    hidden_states = jax.random.normal(k_x, (B, L, H), jnp.float32)
    attention_mask = jnp.ones((B, L), jnp.float32).at[1, -2:].set(0.0)  # pad 2
    params = make_params(k_p)

    out = bert_layer_untied(hidden_states, attention_mask, params,
                            diagonal_mask=False, temporal_tokens=None)
    out = jax.block_until_ready(out)

    ref = ref_bert_layer(hidden_states, attention_mask, params,
                         diagonal_mask=False)
    assert out.shape == (B, L, H)
    err = float(jnp.max(jnp.abs(out - ref)))
    # Tolerance allows for the approx-reciprocal softmax denominator.
    assert err < 1e-3, f"mismatch vs JAX reference: {err}"

    print("KERNEL_OK")
</pallas_src>

<mosaic_0001>
module attributes {stable_mosaic.version = 11 : i64} {
  func.func @bert_layer_kernel(%arg0: memref<16x32xf32, #tpu.memory_space<vmem>>, %arg1: memref<2x8xf32, #tpu.memory_space<vmem>>, %arg2: memref<32x96xf32, #tpu.memory_space<vmem>>, %arg3: memref<32x32xf32, #tpu.memory_space<vmem>>, %arg4: memref<32x128xf32, #tpu.memory_space<vmem>>, %arg5: memref<128x32xf32, #tpu.memory_space<vmem>>, %arg6: memref<8x128xf32, #tpu.memory_space<vmem>>, %arg7: memref<16x32xf32, #tpu.memory_space<vmem>>) attributes {dimension_semantics = [], scalar_prefetch = 0 : i64, scratch_operands = 0 : i64, tpu.core_type = #tpu.core_type<tc>} {
    %c0 = arith.constant 0 : index
    %c0_0 = arith.constant 0 : index
    %0 = vector.load %arg0[%c0, %c0_0] : memref<16x32xf32, #tpu.memory_space<vmem>>, vector<16x32xf32>
    %c0_1 = arith.constant 0 : index
    %c0_2 = arith.constant 0 : index
    %1 = vector.load %arg1[%c0_1, %c0_2] : memref<2x8xf32, #tpu.memory_space<vmem>>, vector<2x8xf32>
    %c0_3 = arith.constant 0 : index
    %c0_4 = arith.constant 0 : index
    %2 = vector.load %arg6[%c0_3, %c0_4] : memref<8x128xf32, #tpu.memory_space<vmem>>, vector<8x128xf32>
    %3 = vector.extract_strided_slice %2 {offsets = [0, 0], sizes = [1, 96], strides = [1, 1]} : vector<8x128xf32> to vector<1x96xf32>
    %4 = vector.extract_strided_slice %2 {offsets = [1, 0], sizes = [1, 32], strides = [1, 1]} : vector<8x128xf32> to vector<1x32xf32>
    %5 = vector.extract_strided_slice %2 {offsets = [2, 0], sizes = [1, 32], strides = [1, 1]} : vector<8x128xf32> to vector<1x32xf32>
    %6 = vector.extract_strided_slice %2 {offsets = [3, 0], sizes = [1, 32], strides = [1, 1]} : vector<8x128xf32> to vector<1x32xf32>
    %7 = vector.extract_strided_slice %2 {offsets = [4, 0], sizes = [1, 128], strides = [1, 1]} : vector<8x128xf32> to vector<1x128xf32>
    %8 = vector.extract_strided_slice %2 {offsets = [5, 0], sizes = [1, 32], strides = [1, 1]} : vector<8x128xf32> to vector<1x32xf32>
    %9 = vector.extract_strided_slice %2 {offsets = [6, 0], sizes = [1, 32], strides = [1, 1]} : vector<8x128xf32> to vector<1x32xf32>
    %10 = vector.extract_strided_slice %2 {offsets = [7, 0], sizes = [1, 32], strides = [1, 1]} : vector<8x128xf32> to vector<1x32xf32>
    %c0_5 = arith.constant 0 : index
    %c0_6 = arith.constant 0 : index
    %11 = vector.load %arg2[%c0_5, %c0_6] : memref<32x96xf32, #tpu.memory_space<vmem>>, vector<32x96xf32>
    %cst = arith.constant dense<0.000000e+00> : vector<16x96xf32>
    %12 = tpu.matmul %0, %11, %cst {dimension_numbers = #tpu.dot_dimension_numbers<[1], [0], [0], [1], [0, 0, 1, 1], [], []>} : vector<16x32xf32>, vector<32x96xf32>, vector<16x96xf32> -> vector<16x96xf32>
    %13 = vector.broadcast %3 : vector<1x96xf32> to vector<16x96xf32>
    %14 = arith.addf %12, %13 : vector<16x96xf32>
    %15 = vector.shape_cast %1 : vector<2x8xf32> to vector<2x1x8xf32>
    %cst_7 = arith.constant 1.000000e+00 : f32
    %16 = vector.broadcast %cst_7 : f32 to vector<2x1x8xf32>
    %17 = arith.subf %16, %15 : vector<2x1x8xf32>
    %cst_8 = arith.constant -1.000000e+04 : f32
    %18 = vector.broadcast %cst_8 : f32 to vector<2x1x8xf32>
    %19 = arith.mulf %17, %18 : vector<2x1x8xf32>
    %20 = vector.extract_strided_slice %14 {offsets = [0, 0], sizes = [16, 8], strides = [1, 1]} : vector<16x96xf32> to vector<16x8xf32>
    %21 = vector.shape_cast %20 : vector<16x8xf32> to vector<2x8x8xf32>
    %22 = vector.extract_strided_slice %14 {offsets = [0, 32], sizes = [16, 8], strides = [1, 1]} : vector<16x96xf32> to vector<16x8xf32>
    %23 = vector.shape_cast %22 : vector<16x8xf32> to vector<2x8x8xf32>
    %24 = vector.extract_strided_slice %14 {offsets = [0, 64], sizes = [16, 8], strides = [1, 1]} : vector<16x96xf32> to vector<16x8xf32>
    %25 = vector.shape_cast %24 : vector<16x8xf32> to vector<2x8x8xf32>
    "tpu.trace_start"() <{level = 10 : i32, message = "bqd,bkd->bqk"}> : () -> ()
    %cst_9 = arith.constant dense<0.000000e+00> : vector<2x8x8xf32>
    %26 = tpu.matmul %21, %23, %cst_9 {dimension_numbers = #tpu.dot_dimension_numbers<[2], [2], [1], [1], [0, 0, 0, 1, 1, 1], [0], [0]>} : vector<2x8x8xf32>, vector<2x8x8xf32>, vector<2x8x8xf32> -> vector<2x8x8xf32>
    "tpu.trace_stop"() : () -> ()
    %cst_10 = arith.constant 0.353553385 : f32
    %27 = vector.broadcast %cst_10 : f32 to vector<2x8x8xf32>
    %28 = arith.mulf %26, %27 : vector<2x8x8xf32>
    %29 = vector.broadcast %19 : vector<2x1x8xf32> to vector<2x8x8xf32>
    %30 = arith.addf %28, %29 : vector<2x8x8xf32>
    %cst_11 = arith.constant dense<0xFF800000> : vector<2x8xf32>
    %31 = vector.multi_reduction <maximumf>, %30, %cst_11 [2] : vector<2x8x8xf32> to vector<2x8xf32>
    %32 = vector.shape_cast %31 : vector<2x8xf32> to vector<2x8x1xf32>
    %33 = vector.broadcast %32 : vector<2x8x1xf32> to vector<2x8x8xf32>
    %34 = arith.subf %30, %33 : vector<2x8x8xf32>
    %35 = math.exp %34 : vector<2x8x8xf32>
    %cst_12 = arith.constant dense<0.000000e+00> : vector<2x8xf32>
    %36 = vector.multi_reduction <add>, %35, %cst_12 [2] : vector<2x8x8xf32> to vector<2x8xf32>
    %37 = vector.shape_cast %36 : vector<2x8xf32> to vector<2x8x1xf32>
    %38 = tpu.reciprocal %37 {approx = true} : vector<2x8x1xf32> -> vector<2x8x1xf32>
    %39 = vector.broadcast %38 : vector<2x8x1xf32> to vector<2x8x8xf32>
    %40 = arith.mulf %35, %39 : vector<2x8x8xf32>
    "tpu.trace_start"() <{level = 10 : i32, message = "bqk,bkd->bqd"}> : () -> ()
    %cst_13 = arith.constant dense<0.000000e+00> : vector<2x8x8xf32>
    %41 = tpu.matmul %40, %25, %cst_13 {dimension_numbers = #tpu.dot_dimension_numbers<[2], [1], [1], [2], [0, 0, 0, 1, 1, 2], [0], [0]>} : vector<2x8x8xf32>, vector<2x8x8xf32>, vector<2x8x8xf32> -> vector<2x8x8xf32>
    "tpu.trace_stop"() : () -> ()
    %42 = vector.extract_strided_slice %14 {offsets = [0, 8], sizes = [16, 8], strides = [1, 1]} : vector<16x96xf32> to vector<16x8xf32>
    %43 = vector.shape_cast %42 : vector<16x8xf32> to vector<2x8x8xf32>
    %44 = vector.extract_strided_slice %14 {offsets = [0, 40], sizes = [16, 8], strides = [1, 1]} : vector<16x96xf32> to vector<16x8xf32>
    %45 = vector.shape_cast %44 : vector<16x8xf32> to vector<2x8x8xf32>
    %46 = vector.extract_strided_slice %14 {offsets = [0, 72], sizes = [16, 8], strides = [1, 1]} : vector<16x96xf32> to vector<16x8xf32>
    %47 = vector.shape_cast %46 : vector<16x8xf32> to vector<2x8x8xf32>
    "tpu.trace_start"() <{level = 10 : i32, message = "bqd,bkd->bqk"}> : () -> ()
    %cst_14 = arith.constant dense<0.000000e+00> : vector<2x8x8xf32>
    %48 = tpu.matmul %43, %45, %cst_14 {dimension_numbers = #tpu.dot_dimension_numbers<[2], [2], [1], [1], [0, 0, 0, 1, 1, 1], [0], [0]>} : vector<2x8x8xf32>, vector<2x8x8xf32>, vector<2x8x8xf32> -> vector<2x8x8xf32>
    "tpu.trace_stop"() : () -> ()
    %cst_15 = arith.constant 0.353553385 : f32
    %49 = vector.broadcast %cst_15 : f32 to vector<2x8x8xf32>
    %50 = arith.mulf %48, %49 : vector<2x8x8xf32>
    %51 = vector.broadcast %19 : vector<2x1x8xf32> to vector<2x8x8xf32>
    %52 = arith.addf %50, %51 : vector<2x8x8xf32>
    %cst_16 = arith.constant dense<0xFF800000> : vector<2x8xf32>
    %53 = vector.multi_reduction <maximumf>, %52, %cst_16 [2] : vector<2x8x8xf32> to vector<2x8xf32>
    %54 = vector.shape_cast %53 : vector<2x8xf32> to vector<2x8x1xf32>
    %55 = vector.broadcast %54 : vector<2x8x1xf32> to vector<2x8x8xf32>
    %56 = arith.subf %52, %55 : vector<2x8x8xf32>
    %57 = math.exp %56 : vector<2x8x8xf32>
    %cst_17 = arith.constant dense<0.000000e+00> : vector<2x8xf32>
    %58 = vector.multi_reduction <add>, %57, %cst_17 [2] : vector<2x8x8xf32> to vector<2x8xf32>
    %59 = vector.shape_cast %58 : vector<2x8xf32> to vector<2x8x1xf32>
    %60 = tpu.reciprocal %59 {approx = true} : vector<2x8x1xf32> -> vector<2x8x1xf32>
    %61 = vector.broadcast %60 : vector<2x8x1xf32> to vector<2x8x8xf32>
    %62 = arith.mulf %57, %61 : vector<2x8x8xf32>
    "tpu.trace_start"() <{level = 10 : i32, message = "bqk,bkd->bqd"}> : () -> ()
    %cst_18 = arith.constant dense<0.000000e+00> : vector<2x8x8xf32>
    %63 = tpu.matmul %62, %47, %cst_18 {dimension_numbers = #tpu.dot_dimension_numbers<[2], [1], [1], [2], [0, 0, 0, 1, 1, 2], [0], [0]>} : vector<2x8x8xf32>, vector<2x8x8xf32>, vector<2x8x8xf32> -> vector<2x8x8xf32>
    "tpu.trace_stop"() : () -> ()
    %64 = vector.extract_strided_slice %14 {offsets = [0, 16], sizes = [16, 8], strides = [1, 1]} : vector<16x96xf32> to vector<16x8xf32>
    %65 = vector.shape_cast %64 : vector<16x8xf32> to vector<2x8x8xf32>
    %66 = vector.extract_strided_slice %14 {offsets = [0, 48], sizes = [16, 8], strides = [1, 1]} : vector<16x96xf32> to vector<16x8xf32>
    %67 = vector.shape_cast %66 : vector<16x8xf32> to vector<2x8x8xf32>
    %68 = vector.extract_strided_slice %14 {offsets = [0, 80], sizes = [16, 8], strides = [1, 1]} : vector<16x96xf32> to vector<16x8xf32>
    %69 = vector.shape_cast %68 : vector<16x8xf32> to vector<2x8x8xf32>
    "tpu.trace_start"() <{level = 10 : i32, message = "bqd,bkd->bqk"}> : () -> ()
    %cst_19 = arith.constant dense<0.000000e+00> : vector<2x8x8xf32>
    %70 = tpu.matmul %65, %67, %cst_19 {dimension_numbers = #tpu.dot_dimension_numbers<[2], [2], [1], [1], [0, 0, 0, 1, 1, 1], [0], [0]>} : vector<2x8x8xf32>, vector<2x8x8xf32>, vector<2x8x8xf32> -> vector<2x8x8xf32>
    "tpu.trace_stop"() : () -> ()
    %cst_20 = arith.constant 0.353553385 : f32
    %71 = vector.broadcast %cst_20 : f32 to vector<2x8x8xf32>
    %72 = arith.mulf %70, %71 : vector<2x8x8xf32>
    %73 = vector.broadcast %19 : vector<2x1x8xf32> to vector<2x8x8xf32>
    %74 = arith.addf %72, %73 : vector<2x8x8xf32>
    %cst_21 = arith.constant dense<0xFF800000> : vector<2x8xf32>
    %75 = vector.multi_reduction <maximumf>, %74, %cst_21 [2] : vector<2x8x8xf32> to vector<2x8xf32>
    %76 = vector.shape_cast %75 : vector<2x8xf32> to vector<2x8x1xf32>
    %77 = vector.broadcast %76 : vector<2x8x1xf32> to vector<2x8x8xf32>
    %78 = arith.subf %74, %77 : vector<2x8x8xf32>
    %79 = math.exp %78 : vector<2x8x8xf32>
    %cst_22 = arith.constant dense<0.000000e+00> : vector<2x8xf32>
    %80 = vector.multi_reduction <add>, %79, %cst_22 [2] : vector<2x8x8xf32> to vector<2x8xf32>
    %81 = vector.shape_cast %80 : vector<2x8xf32> to vector<2x8x1xf32>
    %82 = tpu.reciprocal %81 {approx = true} : vector<2x8x1xf32> -> vector<2x8x1xf32>
    %83 = vector.broadcast %82 : vector<2x8x1xf32> to vector<2x8x8xf32>
    %84 = arith.mulf %79, %83 : vector<2x8x8xf32>
    "tpu.trace_start"() <{level = 10 : i32, message = "bqk,bkd->bqd"}> : () -> ()
    %cst_23 = arith.constant dense<0.000000e+00> : vector<2x8x8xf32>
    %85 = tpu.matmul %84, %69, %cst_23 {dimension_numbers = #tpu.dot_dimension_numbers<[2], [1], [1], [2], [0, 0, 0, 1, 1, 2], [0], [0]>} : vector<2x8x8xf32>, vector<2x8x8xf32>, vector<2x8x8xf32> -> vector<2x8x8xf32>
    "tpu.trace_stop"() : () -> ()
    %86 = vector.extract_strided_slice %14 {offsets = [0, 24], sizes = [16, 8], strides = [1, 1]} : vector<16x96xf32> to vector<16x8xf32>
    %87 = vector.shape_cast %86 : vector<16x8xf32> to vector<2x8x8xf32>
    %88 = vector.extract_strided_slice %14 {offsets = [0, 56], sizes = [16, 8], strides = [1, 1]} : vector<16x96xf32> to vector<16x8xf32>
    %89 = vector.shape_cast %88 : vector<16x8xf32> to vector<2x8x8xf32>
    %90 = vector.extract_strided_slice %14 {offsets = [0, 88], sizes = [16, 8], strides = [1, 1]} : vector<16x96xf32> to vector<16x8xf32>
    %91 = vector.shape_cast %90 : vector<16x8xf32> to vector<2x8x8xf32>
    "tpu.trace_start"() <{level = 10 : i32, message = "bqd,bkd->bqk"}> : () -> ()
    %cst_24 = arith.constant dense<0.000000e+00> : vector<2x8x8xf32>
    %92 = tpu.matmul %87, %89, %cst_24 {dimension_numbers = #tpu.dot_dimension_numbers<[2], [2], [1], [1], [0, 0, 0, 1, 1, 1], [0], [0]>} : vector<2x8x8xf32>, vector<2x8x8xf32>, vector<2x8x8xf32> -> vector<2x8x8xf32>
    "tpu.trace_stop"() : () -> ()
    %cst_25 = arith.constant 0.353553385 : f32
    %93 = vector.broadcast %cst_25 : f32 to vector<2x8x8xf32>
    %94 = arith.mulf %92, %93 : vector<2x8x8xf32>
    %95 = vector.broadcast %19 : vector<2x1x8xf32> to vector<2x8x8xf32>
    %96 = arith.addf %94, %95 : vector<2x8x8xf32>
    %cst_26 = arith.constant dense<0xFF800000> : vector<2x8xf32>
    %97 = vector.multi_reduction <maximumf>, %96, %cst_26 [2] : vector<2x8x8xf32> to vector<2x8xf32>
    %98 = vector.shape_cast %97 : vector<2x8xf32> to vector<2x8x1xf32>
    %99 = vector.broadcast %98 : vector<2x8x1xf32> to vector<2x8x8xf32>
    %100 = arith.subf %96, %99 : vector<2x8x8xf32>
    %101 = math.exp %100 : vector<2x8x8xf32>
    %cst_27 = arith.constant dense<0.000000e+00> : vector<2x8xf32>
    %102 = vector.multi_reduction <add>, %101, %cst_27 [2] : vector<2x8x8xf32> to vector<2x8xf32>
    %103 = vector.shape_cast %102 : vector<2x8xf32> to vector<2x8x1xf32>
    %104 = tpu.reciprocal %103 {approx = true} : vector<2x8x1xf32> -> vector<2x8x1xf32>
    %105 = vector.broadcast %104 : vector<2x8x1xf32> to vector<2x8x8xf32>
    %106 = arith.mulf %101, %105 : vector<2x8x8xf32>
    "tpu.trace_start"() <{level = 10 : i32, message = "bqk,bkd->bqd"}> : () -> ()
    %cst_28 = arith.constant dense<0.000000e+00> : vector<2x8x8xf32>
    %107 = tpu.matmul %106, %91, %cst_28 {dimension_numbers = #tpu.dot_dimension_numbers<[2], [1], [1], [2], [0, 0, 0, 1, 1, 2], [0], [0]>} : vector<2x8x8xf32>, vector<2x8x8xf32>, vector<2x8x8xf32> -> vector<2x8x8xf32>
    "tpu.trace_stop"() : () -> ()
    %108 = tpu.concatenate %41, %63, %85, %107 in 2 : vector<2x8x8xf32>, vector<2x8x8xf32>, vector<2x8x8xf32>, vector<2x8x8xf32> -> vector<2x8x32xf32>
    %109 = vector.shape_cast %108 : vector<2x8x32xf32> to vector<16x32xf32>
    %c0_29 = arith.constant 0 : index
    %c0_30 = arith.constant 0 : index
    %110 = vector.load %arg3[%c0_29, %c0_30] : memref<32x32xf32, #tpu.memory_space<vmem>>, vector<32x32xf32>
    %cst_31 = arith.constant dense<0.000000e+00> : vector<16x32xf32>
    %111 = tpu.matmul %109, %110, %cst_31 {dimension_numbers = #tpu.dot_dimension_numbers<[1], [0], [0], [1], [0, 0, 1, 1], [], []>} : vector<16x32xf32>, vector<32x32xf32>, vector<16x32xf32> -> vector<16x32xf32>
    %112 = vector.broadcast %4 : vector<1x32xf32> to vector<16x32xf32>
    %113 = arith.addf %111, %112 : vector<16x32xf32>
    %114 = arith.addf %113, %0 : vector<16x32xf32>
    %cst_32 = arith.constant dense<0.000000e+00> : vector<16xf32>
    %115 = vector.multi_reduction <add>, %114, %cst_32 [1] : vector<16x32xf32> to vector<16xf32>
    %116 = vector.shape_cast %115 : vector<16xf32> to vector<16x1xf32>
    %cst_33 = arith.constant 3.200000e+01 : f32
    %117 = vector.broadcast %cst_33 : f32 to vector<16x1xf32>
    %118 = arith.divf %116, %117 : vector<16x1xf32>
    %119 = vector.broadcast %118 : vector<16x1xf32> to vector<16x32xf32>
    %120 = arith.subf %114, %119 : vector<16x32xf32>
    %121 = arith.mulf %120, %120 : vector<16x32xf32>
    %cst_34 = arith.constant dense<0.000000e+00> : vector<16xf32>
    %122 = vector.multi_reduction <add>, %121, %cst_34 [1] : vector<16x32xf32> to vector<16xf32>
    %123 = vector.shape_cast %122 : vector<16xf32> to vector<16x1xf32>
    %cst_35 = arith.constant 3.200000e+01 : f32
    %124 = vector.broadcast %cst_35 : f32 to vector<16x1xf32>
    %125 = arith.divf %123, %124 : vector<16x1xf32>
    %126 = vector.broadcast %118 : vector<16x1xf32> to vector<16x32xf32>
    %127 = arith.subf %114, %126 : vector<16x32xf32>
    %cst_36 = arith.constant 9.99999996E-13 : f32
    %128 = vector.broadcast %cst_36 : f32 to vector<16x1xf32>
    %129 = arith.addf %125, %128 : vector<16x1xf32>
    %130 = math.rsqrt %129 : vector<16x1xf32>
    %131 = vector.broadcast %130 : vector<16x1xf32> to vector<16x32xf32>
    %132 = arith.mulf %127, %131 : vector<16x32xf32>
    %133 = vector.broadcast %5 : vector<1x32xf32> to vector<16x32xf32>
    %134 = arith.mulf %132, %133 : vector<16x32xf32>
    %135 = vector.broadcast %6 : vector<1x32xf32> to vector<16x32xf32>
    %136 = arith.addf %134, %135 : vector<16x32xf32>
    %c0_37 = arith.constant 0 : index
    %c0_38 = arith.constant 0 : index
    %137 = vector.load %arg4[%c0_37, %c0_38] : memref<32x128xf32, #tpu.memory_space<vmem>>, vector<32x128xf32>
    %cst_39 = arith.constant dense<0.000000e+00> : vector<16x128xf32>
    %138 = tpu.matmul %136, %137, %cst_39 {dimension_numbers = #tpu.dot_dimension_numbers<[1], [0], [0], [1], [0, 0, 1, 1], [], []>} : vector<16x32xf32>, vector<32x128xf32>, vector<16x128xf32> -> vector<16x128xf32>
    %139 = vector.broadcast %7 : vector<1x128xf32> to vector<16x128xf32>
    %140 = arith.addf %138, %139 : vector<16x128xf32>
    %cst_40 = arith.constant 5.000000e-01 : f32
    %141 = vector.broadcast %cst_40 : f32 to vector<16x128xf32>
    %142 = arith.mulf %141, %140 : vector<16x128xf32>
    %cst_41 = arith.constant 1.41421354 : f32
    %143 = vector.broadcast %cst_41 : f32 to vector<16x128xf32>
    %144 = arith.divf %140, %143 : vector<16x128xf32>
    %145 = math.erf %144 : vector<16x128xf32>
    %cst_42 = arith.constant 1.000000e+00 : f32
    %146 = vector.broadcast %cst_42 : f32 to vector<16x128xf32>
    %147 = arith.addf %146, %145 : vector<16x128xf32>
    %148 = arith.mulf %142, %147 : vector<16x128xf32>
    %c0_43 = arith.constant 0 : index
    %c0_44 = arith.constant 0 : index
    %149 = vector.load %arg5[%c0_43, %c0_44] : memref<128x32xf32, #tpu.memory_space<vmem>>, vector<128x32xf32>
    %cst_45 = arith.constant dense<0.000000e+00> : vector<16x32xf32>
    %150 = tpu.matmul %148, %149, %cst_45 {dimension_numbers = #tpu.dot_dimension_numbers<[1], [0], [0], [1], [0, 0, 1, 1], [], []>} : vector<16x128xf32>, vector<128x32xf32>, vector<16x32xf32> -> vector<16x32xf32>
    %151 = vector.broadcast %8 : vector<1x32xf32> to vector<16x32xf32>
    %152 = arith.addf %150, %151 : vector<16x32xf32>
    %153 = arith.addf %152, %136 : vector<16x32xf32>
    %cst_46 = arith.constant dense<0.000000e+00> : vector<16xf32>
    %154 = vector.multi_reduction <add>, %153, %cst_46 [1] : vector<16x32xf32> to vector<16xf32>
    %155 = vector.shape_cast %154 : vector<16xf32> to vector<16x1xf32>
    %cst_47 = arith.constant 3.200000e+01 : f32
    %156 = vector.broadcast %cst_47 : f32 to vector<16x1xf32>
    %157 = arith.divf %155, %156 : vector<16x1xf32>
    %158 = vector.broadcast %157 : vector<16x1xf32> to vector<16x32xf32>
    %159 = arith.subf %153, %158 : vector<16x32xf32>
    %160 = arith.mulf %159, %159 : vector<16x32xf32>
    %cst_48 = arith.constant dense<0.000000e+00> : vector<16xf32>
    %161 = vector.multi_reduction <add>, %160, %cst_48 [1] : vector<16x32xf32> to vector<16xf32>
    %162 = vector.shape_cast %161 : vector<16xf32> to vector<16x1xf32>
    %cst_49 = arith.constant 3.200000e+01 : f32
    %163 = vector.broadcast %cst_49 : f32 to vector<16x1xf32>
    %164 = arith.divf %162, %163 : vector<16x1xf32>
    %165 = vector.broadcast %157 : vector<16x1xf32> to vector<16x32xf32>
    %166 = arith.subf %153, %165 : vector<16x32xf32>
    %cst_50 = arith.constant 9.99999996E-13 : f32
    %167 = vector.broadcast %cst_50 : f32 to vector<16x1xf32>
    %168 = arith.addf %164, %167 : vector<16x1xf32>
    %169 = math.rsqrt %168 : vector<16x1xf32>
    %170 = vector.broadcast %169 : vector<16x1xf32> to vector<16x32xf32>
    %171 = arith.mulf %166, %170 : vector<16x32xf32>
    %172 = vector.broadcast %9 : vector<1x32xf32> to vector<16x32xf32>
    %173 = arith.mulf %171, %172 : vector<16x32xf32>
    %174 = vector.broadcast %10 : vector<1x32xf32> to vector<16x32xf32>
    %175 = arith.addf %173, %174 : vector<16x32xf32>
    %c0_51 = arith.constant 0 : index
    %c0_52 = arith.constant 0 : index
    %176 = vector.load %arg7[%c0_51, %c0_52] : memref<16x32xf32, #tpu.memory_space<vmem>>, vector<16x32xf32>
    tpu.vector_store %arg7[%c0_51, %c0_52], %175 {strides = array<i32>} : memref<16x32xf32, #tpu.memory_space<vmem>>, vector<16x32xf32>,
    return
  }
}

</mosaic_0001>

<bundles_post_ra>
// kernel: tpu_custom_call.1
= control target key start
LH: loop header
LB: loop body
LE: loop exit
PB: predicated region body
PF: predicated region fallthrough
CT: control target
= control target key end

     0   :  { %vm39_vm0 = vcmask 261120   ;;  %s2659_s0 = inlined_call_operand.vmem [shape: f32[16,32], index: 0, kind: input, shape index: {}]   ;;  %s2660_s1 = inlined_call_operand.vmem [shape: f32[2,8], index: 1, kind: input, shape index: {}]   ;;  %s2661_s2 = inlined_call_operand.vmem [shape: f32[32,96], index: 2, kind: input, shape index: {}]   ;;  %s2662_s3 = inlined_call_operand.vmem [shape: f32[32,32], index: 3, kind: input, shape index: {}]   ;;  %s2663_s4 = inlined_call_operand.vmem [shape: f32[32,128], index: 4, kind: input, shape index: {}]   ;;  %s2664_s5 = inlined_call_operand.vmem [shape: f32[128,32], index: 5, kind: input, shape index: {}]   ;;  %s2665_s6 = inlined_call_operand.vmem [shape: f32[8,128], index: 6, kind: input, shape index: {}]   ;;  %s2666_s7 = inlined_call_operand.hbm [shape: f32[16,32], index: 7, kind: output, shape index: {}]  }
   0x1   :  { %v31_v0 = vld [vmem:[%s2661_s2] sm:$0xff]  ;;  %v32_v1 = vld [vmem:[%s2661_s2 + $0x8] sm:$0xff]  ;;  %v33_v2 = vld [vmem:[%s2661_s2 + $0x10] sm:$0xff] }
   0x2   :  { %v2159_v3 = vpack.c.bf16 %v32_v1, %v31_v0  ;;  %v34_v4 = vld [vmem:[%s2661_s2 + $0x18] sm:$0xff]  ;;  %v2376_v5 = vld [vmem:[%s2659_s0] sm:$0xff] }
   0x3   :  { %v2163_v6 = vpack.c.bf16 %v34_v4, %v33_v2  ;;  %2019 = vmatprep.mubr.msk.f32.mxu1 %vm39_vm0, %v2376_v5 }
   0x4   :  { %12 = vsyncpa [#allocation3], 0  ;;  %2160 = vmatprep.subr.bf16.mxu1 %v2159_v3  ;;  %v2383_v7 = vld [vmem:[%s2659_s0 + $0x8] sm:$0xff]  ;;  %v2302_v8 = vmov 0.0   ;;  %v35_v9 = vlaneseq  ;;  %vm2303_vm1 = vmmov 0   ;;  %v2399_v12 = vld [vmem:[%s2665_s6] sm:$0xff] }
   0x5   :  { %2162 = vmatpush3.bf16.msra.mxu1 %v2159_v3  ;;  %2032 = vmatprep.subr.mxu0 %v2302_v8  ;;  %s2304_s13 = smov 96   ;;  %vm153_vm2 = vcmask 64512   ;;  %v2305_v20 = vmov 1966171168   ;;  %s2307_s15 = smov 88   ;;  %vm1526_vm3 = vcmask 195584  }
   0x6   :  { %2164 = vmatprep.subr.bf16.mxu1 %v2163_v6  ;;  %v2389_v10 = vshrl.u32 %v35_v9, 7  ;;  %2034 = vmatprep.mubr.msk.f32.mxu0 %vm2303_vm1, %v2302_v8  ;;  %v131_v21 = vunpack.c.l.s4 %v2305_v20  ;;  %v1914_v24 = vld.sshfl [vmem:[%s2660_s1] sm:$0x11 pattern:$0x75316420]  ;;  %s2306_s1 = smov 64  }
   0x7   :  { %v129_v25 = vcombine.high %v1914_v24, %v1914_v24  ;;  %s2308_s16 = smov 120   ;;  %s2309_s17 = smov 56   ;;  %vm1523_vm4 = vcmask 130048  }
   0x8   :  { %v37_v11 = vsub.s32 0, %v2389_v10  ;;  %v132_v22 = vunpack.c.0.s8 %v131_v21  ;;  %s2310_s18 = smov 80   ;;  %s2311_s19 = smov 112  }
   0x9   :  { %2166 = vmatpush3.bf16.msra.mxu1 %v2163_v6  ;;  %s2312_s20 = smov 48   ;;  %s2313_s21 = smov 72  }
   0xa   :  { %2022 = vmatprep.subr.mxu1 %v2302_v8  ;;  %v38_v13 = vrot.slane %v2399_v12, %v37_v11  ;;  %v135_v23 = vsub.s32 %v132_v22, %v2389_v10  ;;  %s2314_s22 = smov 104   ;;  %s2315_s23 = smov 40  }
   0xb   :  { %s2316_s24 = smov 8   ;;  %s2317_s25 = smov 16  }
   0xc   :  { %2020 = vmatmul.mubr.msk.f32.vlgmr.msra.gmra.mrb[0].mxu1 %vm39_vm0, %v2383_v7  ;;  %v136_v26 = vrot.slane %v1914_v24, %v135_v23  ;;  %v143_v28 = vrot.slane %v129_v25, %v135_v23  ;;  %s2318_s11 = smov 24  }
   0xd   :  { %2024 = vmatprep.mubr.msk.f32.mxu1 %vm2303_vm1, %v2302_v8 }
   0xe   :  { %v146_v27 = vsub.f32 1.0, %v136_v26  ;;  %v147_v30 = vsub.f32 1.0, %v143_v28 }
  0x10   :  { %v148_v29 = vmul.f32 -10000.0, %v146_v27  ;;  %v149_v32 = vmul.f32 -10000.0, %v147_v30 }
  0x12   :  { %v2424_v31 = vrot.slane %v148_v29, %v37_v11  ;;  %v2427_v37 = vrot.slane %v149_v32, %v37_v11 }
  0xdf   :  { %v2021_v14 = vpop.f32.mrb[0].mxu1 }
  0xe0   :  { %v112_v15 = vpop.f32.mrb[1].mxu1  ;;  %v2405_v17 = vadd.f32 %v2021_v14, %v38_v13 }
  0xe1   :  { %v2402_v16 = vadd.f32 %v112_v15, %v38_v13 }
  0xe3   :  { %151 = vrot.lane.b32.xlu0 %v2402_v16, %s2304_s13 }
  0xe7   :  { %229 = vrot.lane.b32.xlu0 %v2405_v17, %s2304_s13 }
 0x155   :  { %v152_v18 = vpop.permute.xlu0 %151 }
 0x156   :  { %2023 = vmatpush3.xpose.msk.msra.mxu1 %vm153_vm2, %v152_v18 }
 0x157   :  { %2027 = vmatprep.subr.mxu1 %v2302_v8 }
 0x159   :  { %2025 = vmatmul.mubr.msk.f32.vlgmr.msra.gmra.mrb[2].mxu1 %vm153_vm2, %v2402_v16  ;;  %v230_v19 = vpop.permute.xlu0 %229 }
 0x15a   :  { %2028 = vmatpush3.xpose.msk.msra.mxu1 %vm153_vm2, %v230_v19  ;;  %2029 = vmatprep.mubr.msk.f32.mxu1 %vm2303_vm1, %v2302_v8 }
 0x15b   :  { %2037 = vmatprep.subr.mxu1 %v2302_v8 }
 0x15d   :  { %2030 = vmatmul.mubr.msk.f32.vlgmr.msra.gmra.mrb[4].mxu1 %vm153_vm2, %v2405_v17 }
 0x15e   :  { %2039 = vmatprep.mubr.msk.f32.mxu1 %vm2303_vm1, %v2302_v8 }
 0x22c   :  { %v224_v33 = vpop.f32.mrb[2].mxu1 }
 0x22d   :  { %v305_v34 = vmul.f32 0.35355338, %v224_v33  ;;  %v2026_v35 = vpop.f32.mrb[3].mxu1 }
 0x22f   :  { %v319_v36 = vadd.f32 %v2424_v31, %v305_v34 }
 0x230   :  { %v301_v38 = vpop.f32.mrb[4].mxu1 }
 0x231   :  { %v306_v39 = vmul.f32 0.35355338, %v301_v38  ;;  %v2031_v40 = vpop.f32.mrb[5].mxu1  ;;  %v321_v41 = vsel %vm153_vm2, %v319_v36, -inf }
 0x232   :  { %322 = vmax.xlane.f32.xlu1 %v321_v41 }
 0x233   :  { %v320_v42 = vadd.f32 %v2427_v37, %v306_v39 }
 0x235   :  { %v324_v43 = vsel %vm153_vm2, %v320_v42, -inf }
 0x236   :  { %325 = vmax.xlane.f32.xlu1 %v324_v43 }
 0x247   :  { %343 = vrot.lane.b32.xlu1 %v2402_v16, %s2306_s1 }
 0x24b   :  { %419 = vrot.lane.b32.xlu1 %v2405_v17, %s2306_s1 }
 0x24f   :  { %497 = vrot.lane.b32.xlu1 %v2402_v16, %s2307_s15 }
 0x253   :  { %575 = vrot.lane.b32.xlu1 %v2405_v17, %s2307_s15 }
 0x2bf   :  { %v323_v44 = vpop.xlane.xlu1 %322 }
 0x2c0   :  { %v327_v45 = vsub.f32 %v319_v36, %v323_v44 }
 0x2c2   :  { %v329_v46 = vmul.f32 1.442695, %v327_v45 }
 0x2c3   :  { %v326_v47 = vpop.xlane.xlu1 %325 }
 0x2c4   :  { %2234 = vpow2.f32 %v329_v46  ;;  %v328_v48 = vsub.f32 %v320_v42, %v326_v47 }
 0x2c6   :  { %v331_v49 = vmul.f32 1.442695, %v328_v48 }
 0x2c7   :  { %v344_v50 = vpop.permute.xlu1 %343 }
 0x2c8   :  { %2236 = vpow2.f32 %v331_v49  ;;  %2033 = vmatpush3.msra.mxu0 %v344_v50 }
 0x2c9   :  { %2042 = vmatprep.subr.mxu0 %v2302_v8 }
 0x2cb   :  { %v420_v51 = vpop.permute.xlu1 %419 }
 0x2cc   :  { %2038 = vmatpush3.msra.mxu1 %v420_v51 }
 0x2cd   :  { %2047 = vmatprep.subr.mxu1 %v2302_v8 }
 0x2ce   :  { %v2235_v52 = vpop.eup %2234 }
 0x2cf   :  { %v333_v53 = vsel %vm153_vm2, %v2235_v52, 0.0  ;;  %v498_v56 = vpop.permute.xlu1 %497 }
 0x2d0   :  { %334 = vadd.xlane.f32.xlu0 %v333_v53 }
 0x2d2   :  { %v2237_v54 = vpop.eup %2236 }
 0x2d3   :  { %v336_v55 = vsel %vm153_vm2, %v2237_v54, 0.0  ;;  %v576_v57 = vpop.permute.xlu1 %575 }
 0x2d4   :  { %337 = vadd.xlane.f32.xlu1 %v336_v55 }
 0x2e5   :  { %573 = vrot.lane.b32.xlu1 %v2405_v17, %s2308_s16 }
 0x2e6   :  { %495 = vrot.lane.b32.xlu0 %v2402_v16, %s2308_s16 }
 0x35d   :  { %v335_v58 = vpop.xlane.xlu0 %334 }
 0x35e   :  { %2238 = vrcp.f32 %v335_v58 }
 0x361   :  { %v338_v59 = vpop.xlane.xlu1 %337  ;;  %v496_v0 = vpop.permute.xlu0 %495 }
 0x362   :  { %2240 = vrcp.f32 %v338_v59 }
 0x365   :  { %v574_v1 = vpop.permute.xlu1 %573 }
 0x368   :  { %v2239_v60 = vpop.eup %2238 }
 0x369   :  { %v341_v61 = vmul.f32 %v2239_v60, %v2235_v52 }
 0x36b   :  { %2035 = vmatmul.mubr.msk.f32.vlgmr.msra.gmra.mrb[0].mxu0 %vm153_vm2, %v341_v61 }
 0x36c   :  { %v2241_v62 = vpop.eup %2240  ;;  %2043 = vmatpush3.xpose.msk.msra.mxu0 %vm153_vm2, %v498_v56  ;;  %2044 = vmatprep.mubr.msk.f32.mxu0 %vm2303_vm1, %v2302_v8 }
 0x36d   :  { %v342_v63 = vmul.f32 %v2241_v62, %v2237_v54  ;;  %2052 = vmatprep.subr.mxu0 %v2302_v8 }
 0x36f   :  { %2040 = vmatmul.mubr.msk.f32.vlgmr.msra.gmra.mrb[6].mxu1 %vm153_vm2, %v342_v63  ;;  %2045 = vmatmul.mubr.msk.f32.vlgmr.msra.gmra.mrb[2].mxu0 %vm153_vm2, %v496_v0 }
 0x370   :  { %2048 = vmatpush3.xpose.msk.msra.mxu1 %vm153_vm2, %v576_v57  ;;  %2049 = vmatprep.mubr.msk.f32.mxu1 %vm2303_vm1, %v2302_v8 }
 0x371   :  { %2057 = vmatprep.subr.mxu1 %v2302_v8  ;;  %2054 = vmatprep.mubr.msk.f32.mxu0 %vm2303_vm1, %v2302_v8 }
 0x373   :  { %2050 = vmatmul.mubr.msk.f32.vlgmr.msra.gmra.mrb[8].mxu1 %vm153_vm2, %v574_v1 }
 0x374   :  { %2059 = vmatprep.mubr.msk.f32.mxu1 %vm2303_vm1, %v2302_v8 }
 0x43e   :  { %v2458_v2 = vpop.f32.mrb[0].mxu0 }
 0x43f   :  { %v2036_v3 = vpop.f32.mrb[1].mxu0 }
 0x442   :  { %v2460_v4 = vpop.f32.mrb[6].mxu1  ;;  %v569_v6 = vpop.f32.mrb[2].mxu0 }
 0x443   :  { %v651_v9 = vmul.f32 0.35355338, %v569_v6  ;;  %v2041_v11 = vpop.f32.mrb[7].mxu1  ;;  %v2046_v13 = vpop.f32.mrb[3].mxu0 }
 0x445   :  { %v653_v14 = vadd.f32 %v651_v9, %v2424_v31 }
 0x446   :  { %v647_v15 = vpop.f32.mrb[8].mxu1 }
 0x447   :  { %v652_v18 = vmul.f32 0.35355338, %v647_v15  ;;  %v2051_v19 = vpop.f32.mrb[9].mxu1  ;;  %v655_v20 = vsel %vm153_vm2, %v653_v14, -inf }
 0x448   :  { %656 = vmax.xlane.f32.xlu1 %v655_v20 }
 0x449   :  { %v654_v21 = vadd.f32 %v652_v18, %v2427_v37 }
 0x44b   :  { %v658_v22 = vsel %vm153_vm2, %v654_v21, -inf }
 0x44c   :  { %659 = vmax.xlane.f32.xlu0 %v658_v22 }
 0x459   :  { %677 = vrot.lane.b32.xlu1 %v2402_v16, %s2309_s17 }
 0x45d   :  { %831 = vrot.lane.b32.xlu1 %v2402_v16, %s2310_s18 }
 0x461   :  { %909 = vrot.lane.b32.xlu1 %v2405_v17, %s2310_s18 }
 0x462   :  { %753 = vrot.lane.b32.xlu0 %v2405_v17, %s2309_s17 }
 0x466   :  { %829 = vrot.lane.b32.xlu0 %v2402_v16, %s2311_s19 }
 0x4d5   :  { %v657_v23 = vpop.xlane.xlu1 %656 }
 0x4d6   :  { %v661_v24 = vsub.f32 %v653_v14, %v657_v23 }
 0x4d8   :  { %v663_v25 = vmul.f32 1.442695, %v661_v24 }
 0x4d9   :  { %v678_v26 = vpop.permute.xlu1 %677  ;;  %v660_v27 = vpop.xlane.xlu0 %659 }
 0x4da   :  { %2242 = vpow2.f32 %v663_v25  ;;  %v662_v28 = vsub.f32 %v654_v21, %v660_v27  ;;  %2053 = vmatpush3.msra.mxu0 %v678_v26 }
 0x4db   :  { %2062 = vmatprep.subr.mxu0 %v2302_v8 }
 0x4dc   :  { %v665_v29 = vmul.f32 1.442695, %v662_v28 }
 0x4dd   :  { %v754_v30 = vpop.permute.xlu0 %753  ;;  %v832_v36 = vpop.permute.xlu1 %831 }
 0x4de   :  { %2244 = vpow2.f32 %v665_v29  ;;  %2058 = vmatpush3.msra.mxu1 %v754_v30 }
 0x4df   :  { %2067 = vmatprep.subr.mxu1 %v2302_v8 }
 0x4e1   :  { %v910_v38 = vpop.permute.xlu1 %909  ;;  %v830_v45 = vpop.permute.xlu0 %829 }
 0x4e4   :  { %v2243_v32 = vpop.eup %2242 }
 0x4e5   :  { %v667_v33 = vsel %vm153_vm2, %v2243_v32, 0.0 }
 0x4e6   :  { %668 = vadd.xlane.f32.xlu1 %v667_v33 }
 0x4e8   :  { %v2245_v34 = vpop.eup %2244 }
 0x4e9   :  { %v670_v35 = vsel %vm153_vm2, %v2245_v34, 0.0 }
 0x4ea   :  { %671 = vadd.xlane.f32.xlu1 %v670_v35 }
 0x4fb   :  { %907 = vrot.lane.b32.xlu1 %v2405_v17, %s2311_s19 }
 0x573   :  { %v669_v39 = vpop.xlane.xlu1 %668 }
 0x574   :  { %2246 = vrcp.f32 %v669_v39 }
 0x577   :  { %v672_v40 = vpop.xlane.xlu1 %671 }
 0x578   :  { %2248 = vrcp.f32 %v672_v40 }
 0x57b   :  { %v908_v46 = vpop.permute.xlu1 %907 }
 0x57e   :  { %v2247_v41 = vpop.eup %2246 }
 0x57f   :  { %v675_v42 = vmul.f32 %v2247_v41, %v2243_v32 }
 0x581   :  { %2055 = vmatmul.mubr.msk.f32.vlgmr.msra.gmra.mrb[4].mxu0 %vm153_vm2, %v675_v42 }
 0x582   :  { %v2249_v43 = vpop.eup %2248  ;;  %2063 = vmatpush3.xpose.msk.msra.mxu0 %vm153_vm2, %v832_v36  ;;  %2064 = vmatprep.mubr.msk.f32.mxu0 %vm2303_vm1, %v2302_v8 }
 0x583   :  { %v676_v44 = vmul.f32 %v2249_v43, %v2245_v34  ;;  %2072 = vmatprep.subr.mxu0 %v2302_v8 }
 0x585   :  { %2060 = vmatmul.mubr.msk.f32.vlgmr.msra.gmra.mrb[10].mxu1 %vm153_vm2, %v676_v44  ;;  %2065 = vmatmul.mubr.msk.f32.vlgmr.msra.gmra.mrb[6].mxu0 %vm153_vm2, %v830_v45 }
 0x586   :  { %2068 = vmatpush3.xpose.msk.msra.mxu1 %vm153_vm2, %v910_v38  ;;  %2069 = vmatprep.mubr.msk.f32.mxu1 %vm2303_vm1, %v2302_v8 }
 0x587   :  { %2077 = vmatprep.subr.mxu1 %v2302_v8  ;;  %2074 = vmatprep.mubr.msk.f32.mxu0 %vm2303_vm1, %v2302_v8 }
 0x589   :  { %2070 = vmatmul.mubr.msk.f32.vlgmr.msra.gmra.mrb[12].mxu1 %vm153_vm2, %v908_v46 }
 0x58a   :  { %2079 = vmatprep.mubr.msk.f32.mxu1 %vm2303_vm1, %v2302_v8 }
 0x654   :  { %v2492_v47 = vpop.f32.mrb[4].mxu0 }
 0x655   :  { %v2056_v48 = vpop.f32.mrb[5].mxu0 }
 0x658   :  { %v2494_v49 = vpop.f32.mrb[10].mxu1  ;;  %v903_v50 = vpop.f32.mrb[6].mxu0 }
 0x659   :  { %v985_v51 = vmul.f32 0.35355338, %v903_v50  ;;  %v2061_v52 = vpop.f32.mrb[11].mxu1  ;;  %v2066_v53 = vpop.f32.mrb[7].mxu0 }
 0x65b   :  { %v987_v54 = vadd.f32 %v985_v51, %v2424_v31 }
 0x65c   :  { %v981_v55 = vpop.f32.mrb[12].mxu1 }
 0x65d   :  { %v986_v56 = vmul.f32 0.35355338, %v981_v55  ;;  %v2071_v57 = vpop.f32.mrb[13].mxu1  ;;  %v989_v58 = vsel %vm153_vm2, %v987_v54, -inf }
 0x65e   :  { %990 = vmax.xlane.f32.xlu0 %v989_v58  ;;  %v1529_v58 = vld [vmem:[%s2662_s3] sm:$0xff] }
 0x65f   :  { %v988_v59 = vadd.f32 %v986_v56, %v2427_v37 }
 0x661   :  { %v992_v60 = vsel %vm153_vm2, %v988_v59, -inf }
 0x662   :  { %993 = vmax.xlane.f32.xlu1 %v992_v60  ;;  %v1531_v60 = vld [vmem:[%s2662_s3 + $0x10] sm:$0xff] }
 0x673   :  { %1011 = vrot.lane.b32.xlu1 %v2402_v16, %s2312_s20 }
 0x674   :  { %1087 = vrot.lane.b32.xlu0 %v2405_v17, %s2312_s20 }
 0x677   :  { %1165 = vrot.lane.b32.xlu1 %v2402_v16, %s2313_s21 }
 0x67b   :  { %1243 = vrot.lane.b32.xlu1 %v2405_v17, %s2313_s21 }
 0x67f   :  { %1241 = vrot.lane.b32.xlu1 %v2405_v17, %s2314_s22 }
 0x6eb   :  { %v991_v61 = vpop.xlane.xlu0 %990 }
 0x6ec   :  { %v995_v62 = vsub.f32 %v987_v54, %v991_v61  ;;  %v1532_v61 = vld [vmem:[%s2662_s3 + $0x18] sm:$0xff] }
 0x6ee   :  { %v997_v63 = vmul.f32 1.442695, %v995_v62  ;;  %v2171_v62 = vpack.c.bf16 %v1532_v61, %v1531_v60 }
 0x6ef   :  { %v994_v0 = vpop.xlane.xlu1 %993  ;;  %v1088_v1 = vpop.permute.xlu0 %1087 }
 0x6f0   :  { %2250 = vpow2.f32 %v997_v63  ;;  %v996_v3 = vsub.f32 %v988_v59, %v994_v0  ;;  %2078 = vmatpush3.msra.mxu1 %v1088_v1 }
 0x6f1   :  { %2087 = vmatprep.subr.mxu1 %v2302_v8 }
 0x6f2   :  { %v999_v6 = vmul.f32 1.442695, %v996_v3 }
 0x6f3   :  { %v1012_v9 = vpop.permute.xlu1 %1011 }
 0x6f4   :  { %2252 = vpow2.f32 %v999_v6  ;;  %2073 = vmatpush3.msra.mxu0 %v1012_v9 }
 0x6f5   :  { %2082 = vmatprep.subr.mxu0 %v2302_v8 }
 0x6f7   :  { %v1166_v20 = vpop.permute.xlu1 %1165 }
 0x6fa   :  { %v2251_v11 = vpop.eup %2250 }
 0x6fb   :  { %v1001_v13 = vsel %vm153_vm2, %v2251_v11, 0.0  ;;  %v1244_v24 = vpop.permute.xlu1 %1243 }
 0x6fc   :  { %1002 = vadd.xlane.f32.xlu0 %v1001_v13 }
 0x6fe   :  { %v2253_v14 = vpop.eup %2252 }
 0x6ff   :  { %v1004_v15 = vsel %vm153_vm2, %v2253_v14, 0.0  ;;  %v1242_v27 = vpop.permute.xlu1 %1241 }
 0x700   :  { %1005 = vadd.xlane.f32.xlu0 %v1004_v15 }
 0x716   :  { %1163 = vrot.lane.b32.xlu0 %v2402_v16, %s2314_s22 }
 0x789   :  { %v1003_v18 = vpop.xlane.xlu0 %1002 }
 0x78a   :  { %2254 = vrcp.f32 %v1003_v18 }
 0x78d   :  { %v1006_v19 = vpop.xlane.xlu0 %1005 }
 0x78e   :  { %2256 = vrcp.f32 %v1006_v19 }
 0x791   :  { %v1164_v26 = vpop.permute.xlu0 %1163 }
 0x794   :  { %v2255_v21 = vpop.eup %2254 }
 0x795   :  { %v1009_v22 = vmul.f32 %v2255_v21, %v2251_v11 }
 0x797   :  { %2075 = vmatmul.mubr.msk.f32.vlgmr.msra.gmra.mrb[8].mxu0 %vm153_vm2, %v1009_v22 }
 0x798   :  { %v2257_v23 = vpop.eup %2256  ;;  %2083 = vmatpush3.xpose.msk.msra.mxu0 %vm153_vm2, %v1166_v20  ;;  %2084 = vmatprep.mubr.msk.f32.mxu0 %vm2303_vm1, %v2302_v8 }
 0x799   :  { %v1010_v25 = vmul.f32 %v2257_v23, %v2253_v14  ;;  %2092 = vmatprep.subr.mxu0 %v2302_v8 }
 0x79b   :  { %2080 = vmatmul.mubr.msk.f32.vlgmr.msra.gmra.mrb[14].mxu1 %vm153_vm2, %v1010_v25  ;;  %2085 = vmatmul.mubr.msk.f32.vlgmr.msra.gmra.mrb[10].mxu0 %vm153_vm2, %v1164_v26 }
 0x79c   :  { %2088 = vmatpush3.xpose.msk.msra.mxu1 %vm153_vm2, %v1244_v24  ;;  %2089 = vmatprep.mubr.msk.f32.mxu1 %vm2303_vm1, %v2302_v8  ;;  %v1535_v24 = vsub.s32 1, %v2389_v10 }
 0x79d   :  { %2097 = vmatprep.subr.mxu1 %v2302_v8  ;;  %2094 = vmatprep.mubr.msk.f32.mxu0 %vm2303_vm1, %v2302_v8 }
 0x79e   :  { %v1536_v25 = vrot.slane %v2399_v12, %v1535_v24  ;;  %v1771_v24 = vld [vmem:[%s2664_s5 + $0x60] sm:$0xff] }
 0x79f   :  { %2090 = vmatmul.mubr.msk.f32.vlgmr.msra.gmra.mrb[16].mxu1 %vm153_vm2, %v1242_v27 }
 0x7a0   :  { %2099 = vmatprep.mubr.msk.f32.mxu1 %vm2303_vm1, %v2302_v8 }
 0x86a   :  { %v1083_v28 = vpop.f32.mrb[8].mxu0 }
 0x86b   :  { %v2076_v29 = vpop.f32.mrb[9].mxu0 }
 0x86e   :  { %v1159_v30 = vpop.f32.mrb[14].mxu1  ;;  %v1237_v32 = vpop.f32.mrb[10].mxu0 }
 0x86f   :  { %v1319_v33 = vmul.f32 0.35355338, %v1237_v32  ;;  %v2081_v34 = vpop.f32.mrb[15].mxu1  ;;  %v2086_v35 = vpop.f32.mrb[11].mxu0 }
 0x871   :  { %v1321_v36 = vadd.f32 %v1319_v33, %v2424_v31 }
 0x872   :  { %v1315_v38 = vpop.f32.mrb[16].mxu1 }
 0x873   :  { %v1320_v39 = vmul.f32 0.35355338, %v1315_v38  ;;  %v2091_v40 = vpop.f32.mrb[17].mxu1  ;;  %v1323_v41 = vsel %vm153_vm2, %v1321_v36, -inf }
 0x874   :  { %1324 = vmax.xlane.f32.xlu0 %v1323_v41 }
 0x875   :  { %v1322_v42 = vadd.f32 %v1320_v39, %v2427_v37 }
 0x877   :  { %v1326_v43 = vsel %vm153_vm2, %v1322_v42, -inf }
 0x878   :  { %1327 = vmax.xlane.f32.xlu1 %v1326_v43  ;;  %v1660_v43 = vld [vmem:[%s2663_s4 + $0x8] sm:$0xff] }
 0x889   :  { %1345 = vrot.lane.b32.xlu1 %v2402_v16, %s2315_s23 }
 0x88d   :  { %1499 = vrot.lane.b32.xlu1 %v2492_v47, %s2316_s24 }
 0x891   :  { %1501 = vrot.lane.b32.xlu1 %v2494_v49, %s2316_s24 }
 0x895   :  { %1509 = vrot.lane.b32.xlu1 %v1159_v30, %s2317_s25 }
 0x901   :  { %v1325_v8 = vpop.xlane.xlu0 %1324 }
 0x902   :  { %v1329_v31 = vsub.f32 %v1321_v36, %v1325_v8 }
 0x904   :  { %v1331_v44 = vmul.f32 1.442695, %v1329_v31  ;;  %v1661_v31 = vld [vmem:[%s2663_s4 + $0x10] sm:$0xff] }
 0x905   :  { %v1328_v45 = vpop.xlane.xlu1 %1327 }
 0x906   :  { %2258 = vpow2.f32 %v1331_v44  ;;  %v1330_v37 = vsub.f32 %v1322_v42, %v1328_v45  ;;  %v1662_v44 = vld [vmem:[%s2663_s4 + $0x18] sm:$0xff] }
 0x907   :  { %v2179_v45 = vpack.c.bf16 %v1662_v44, %v1661_v31 }
 0x908   :  { %v1333_v46 = vmul.f32 1.442695, %v1330_v37  ;;  %v1759_v37 = vld [vmem:[%s2664_s5] sm:$0xff] }
 0x909   :  { %v1346_v48 = vpop.permute.xlu1 %1345 }
 0x90a   :  { %2260 = vpow2.f32 %v1333_v46  ;;  %2093 = vmatpush3.msra.mxu0 %v1346_v48  ;;  %v1760_v46 = vld [vmem:[%s2664_s5 + $0x8] sm:$0xff]  ;;  %v1761_v48 = vld [vmem:[%s2664_s5 + $0x10] sm:$0xff] }
 0x90d   :  { %v1500_v6 = vpop.permute.xlu1 %1499 }
 0x90e   :  { %v1521_v13 = vsel %vm153_vm2, %v2458_v2, %v1500_v6 }
 0x910   :  { %v2259_v16 = vpop.eup %2258 }
 0x911   :  { %v1335_v50 = vsel %vm153_vm2, %v2259_v16, 0.0  ;;  %v1502_v9 = vpop.permute.xlu1 %1501 }
 0x912   :  { %1336 = vadd.xlane.f32.xlu0 %v1335_v50  ;;  %v1522_v20 = vsel %vm153_vm2, %v2460_v4, %v1502_v9  ;;  %v1762_v50 = vld [vmem:[%s2664_s5 + $0x18] sm:$0xff] }
 0x914   :  { %v2261_v47 = vpop.eup %2260 }
 0x915   :  { %v1338_v51 = vsel %vm153_vm2, %v2261_v47, 0.0  ;;  %v1510_v14 = vpop.permute.xlu1 %1509 }
 0x916   :  { %1339 = vadd.xlane.f32.xlu0 %v1338_v51  ;;  %v1525_v21 = vsel %vm1523_vm4, %v1522_v20, %v1510_v14  ;;  %v1763_v51 = vld [vmem:[%s2664_s5 + $0x20] sm:$0xff]  ;;  %v1766_v14 = vld [vmem:[%s2664_s5 + $0x38] sm:$0xff] }
 0x92c   :  { %1421 = vrot.lane.b32.xlu0 %v2405_v17, %s2315_s23  ;;  %v1530_v17 = vld [vmem:[%s2662_s3 + $0x8] sm:$0xff] }
 0x92d   :  { %v2167_v59 = vpack.c.bf16 %v1530_v17, %v1529_v58  ;;  %v1649_v17 = vsub.s32 2, %v2389_v10 }
 0x92f   :  { %v1650_v60 = vrot.slane %v2399_v12, %v1649_v17 }
 0x930   :  { %1507 = vrot.lane.b32.xlu0 %v1083_v28, %s2317_s25 }
 0x99f   :  { %v1337_v49 = vpop.xlane.xlu0 %1336 }
 0x9a0   :  { %2262 = vrcp.f32 %v1337_v49  ;;  %v1764_v49 = vld [vmem:[%s2664_s5 + $0x28] sm:$0xff] }
 0x9a3   :  { %v1340_v52 = vpop.xlane.xlu0 %1339 }
 0x9a4   :  { %2264 = vrcp.f32 %v1340_v52  ;;  %v2191_v52 = vpack.c.bf16 %v1764_v49, %v1763_v51 }
 0x9a7   :  { %v1422_v53 = vpop.permute.xlu0 %1421 }
 0x9a8   :  { %2098 = vmatpush3.msra.mxu1 %v1422_v53 }
 0x9a9   :  { %2168 = vmatprep.subr.bf16.mxu1 %v2167_v59 }
 0x9aa   :  { %v2263_v54 = vpop.eup %2262 }
 0x9ab   :  { %v1343_v55 = vmul.f32 %v2263_v54, %v2259_v16  ;;  %v1508_v11 = vpop.permute.xlu0 %1507  ;;  %v2183_v16 = vpack.c.bf16 %v1760_v46, %v1759_v37 }
 0x9ac   :  { %v1524_v15 = vsel %vm1523_vm4, %v1521_v13, %v1508_v11  ;;  %v1765_v13 = vld [vmem:[%s2664_s5 + $0x30] sm:$0xff] }
 0x9ad   :  { %2095 = vmatmul.mubr.msk.f32.vlgmr.msra.gmra.mrb[12].mxu0 %vm153_vm2, %v1343_v55  ;;  %2184 = vmatprep.subr.bf16.mxu0 %v2183_v16 }
 0x9ae   :  { %v2265_v56 = vpop.eup %2264  ;;  %2186 = vmatpush3.bf16.msra.mxu0 %v2183_v16 }
 0x9af   :  { %v1344_v57 = vmul.f32 %v2265_v56, %v2261_v47  ;;  %v2187_v47 = vpack.c.bf16 %v1762_v50, %v1761_v48 }
 0x9b1   :  { %2100 = vmatmul.mubr.msk.f32.vlgmr.msra.gmra.mrb[18].mxu1 %vm153_vm2, %v1344_v57  ;;  %2188 = vmatprep.subr.bf16.mxu0 %v2187_v47 }
 0x9b2   :  { %2170 = vmatpush3.bf16.msra.mxu1 %v2167_v59  ;;  %2190 = vmatpush3.bf16.msra.mxu0 %v2187_v47  ;;  %v1655_v59 = vsub.s32 3, %v2389_v10 }
 0x9b3   :  { %2172 = vmatprep.subr.bf16.mxu1 %v2171_v62  ;;  %2192 = vmatprep.subr.bf16.mxu0 %v2191_v52 }
 0x9b6   :  { %2174 = vmatpush3.bf16.msra.mxu1 %v2171_v62  ;;  %2194 = vmatpush3.bf16.msra.mxu0 %v2191_v52 }
 0xa80   :  { %v1417_v63 = vpop.f32.mrb[12].mxu0 }
 0xa81   :  { %1515 = vrot.lane.b32.xlu0 %v1417_v63, %s2318_s11  ;;  %v2096_v0 = vpop.f32.mrb[13].mxu0  ;;  %v1656_v63 = vrot.slane %v2399_v12, %v1655_v59 }
 0xa84   :  { %v1493_v1 = vpop.f32.mrb[18].mxu1 }
 0xa85   :  { %1517 = vrot.lane.b32.xlu1 %v1493_v1, %s2318_s11  ;;  %v2101_v3 = vpop.f32.mrb[19].mxu1 }
 0xaf3   :  { %v1516_v18 = vpop.permute.xlu0 %1515 }
 0xaf4   :  { %v1527_v19 = vsel %vm1526_vm3, %v1524_v15, %v1516_v18  ;;  %v2195_v15 = vpack.c.bf16 %v1766_v14, %v1765_v13  ;;  %v1767_v18 = vld [vmem:[%s2664_s5 + $0x40] sm:$0xff] }
 0xaf5   :  { %2110 = vmatprep.mubr.msk.f32.mxu1 %vm39_vm0, %v1527_v19  ;;  %v1768_v19 = vld [vmem:[%s2664_s5 + $0x48] sm:$0xff] }
 0xaf6   :  { %2196 = vmatprep.subr.bf16.mxu0 %v2195_v15  ;;  %v2199_v20 = vpack.c.bf16 %v1768_v19, %v1767_v18 }
 0xaf7   :  { %v1518_v22 = vpop.permute.xlu1 %1517  ;;  %2198 = vmatpush3.bf16.msra.mxu0 %v2195_v15 }
 0xaf8   :  { %v1528_v23 = vsel %vm1526_vm3, %v1525_v21, %v1518_v22  ;;  %2200 = vmatprep.subr.bf16.mxu0 %v2199_v20  ;;  %v1769_v21 = vld [vmem:[%s2664_s5 + $0x50] sm:$0xff]  ;;  %v1770_v22 = vld [vmem:[%s2664_s5 + $0x58] sm:$0xff] }
 0xaf9   :  { %2111 = vmatmul.mubr.msk.f32.vlgmr.msra.gmra.mrb[20].mxu1 %vm39_vm0, %v1528_v23  ;;  %v2203_v23 = vpack.c.bf16 %v1770_v22, %v1769_v21 }
 0xafb   :  { %2202 = vmatpush3.bf16.msra.mxu0 %v2199_v20 }
 0xafc   :  { %2204 = vmatprep.subr.bf16.mxu0 %v2203_v23 }
 0xaff   :  { %2206 = vmatpush3.bf16.msra.mxu0 %v2203_v23 }
 0xbcc   :  { %v2112_v2 = vpop.f32.mrb[20].mxu1 }
 0xbcd   :  { %v1615_v26 = vadd.f32 %v2112_v2, %v1536_v25  ;;  %v1609_v27 = vpop.f32.mrb[21].mxu1 }
 0xbce   :  { %v1610_v28 = vadd.f32 %v1609_v27, %v1536_v25  ;;  %v1772_v25 = vld [vmem:[%s2664_s5 + $0x68] sm:$0xff]  ;;  %v1774_v27 = vld [vmem:[%s2664_s5 + $0x78] sm:$0xff] }
 0xbcf   :  { %v1619_v29 = vadd.f32 %v1615_v26, %v2383_v7  ;;  %v2207_v2 = vpack.c.bf16 %v1772_v25, %v1771_v24  ;;  %v1773_v26 = vld [vmem:[%s2664_s5 + $0x70] sm:$0xff]  ;;  %s2319_s5 = smov [#allocation2]  }
 0xbd0   :  { %v1618_v30 = vadd.f32 %v1610_v28, %v2376_v5  ;;  %v1659_v5 = vld [vmem:[%s2663_s4] sm:$0xff]  ;;  %v2211_v28 = vpack.c.bf16 %v1774_v27, %v1773_v26  ;;  %s1901_s19 = sshll.u32 %s2319_s5, 4  ;;  %s1902_s19 = int_to_ptr.vmem [resolvable:$true] %s1901_s19 }
 0xbd1   :  { %v1623_v32 = vsel %vm39_vm0, %v1619_v29, 0.0  ;;  %v2175_v8 = vpack.c.bf16 %v1660_v43, %v1659_v5  ;;  %2208 = vmatprep.subr.bf16.mxu0 %v2207_v2  ;;  %s2278_s20 = scalar_lea.vmem %s1902_s19, 256  ;;  %p2283_p1 = scmp.lt.s32.totalorder %s1902_s19, %s1902_s19 }
 0xbd2   :  { %1624 = vadd.xlane.f32.xlu1 %v1623_v32  ;;  %v1620_v4 = vsel %vm39_vm0, %v1618_v30, 0.0  ;;  %2210 = vmatpush3.bf16.msra.mxu0 %v2207_v2  ;;  %p2279_p0 = scmp.ne.s32.totalorder %s1902_s19, %s2278_s20  ;;  %p2284_p2 = scmp.lt.s32.totalorder %s2278_s20, %s2278_s20 }
 0xbd3   :  { %1621 = vadd.xlane.f32.xlu0 %v1620_v4  ;;  %2176 = vmatprep.subr.bf16.mxu1 %v2175_v8 }
 0xbd4   :  { %2178 = vmatpush3.bf16.msra.mxu1 %v2175_v8  ;;  %2212 = vmatprep.subr.bf16.mxu0 %v2211_v28  ;;  %v1777_v8 = vsub.s32 5, %v2389_v10  ;;  %p2285_p3 = por %p2284_p2, %p2283_p1 }
 0xbd5   :  { %2180 = vmatprep.subr.bf16.mxu1 %v2179_v45 }
 0xbd6   :  { %2214 = vmatpush3.bf16.msra.mxu0 %v2211_v28  ;;  %v1778_v31 = vrot.slane %v2399_v12, %v1777_v8  ;;  %p2286_p4 = pnand %p2285_p3, %p2279_p0 }
 0xbd8   :  { %2182 = vmatpush3.bf16.msra.mxu1 %v2179_v45 }
 0xc5f   :  { %v1625_v33 = vpop.xlane.xlu1 %1624 }
 0xc60   :  { %v1628_v34 = vmul.f32 0.03125, %v1625_v33  ;;  %v1622_v35 = vpop.xlane.xlu0 %1621 }
 0xc61   :  { %v1627_v36 = vmul.f32 0.03125, %v1622_v35 }
 0xc62   :  { %v1630_v38 = vsub.f32 %v1619_v29, %v1628_v34  ;;  %v1665_v29 = vsub.s32 4, %v2389_v10 }
 0xc63   :  { %v1629_v39 = vsub.f32 %v1618_v30, %v1627_v36 }
 0xc64   :  { %v1632_v42 = vmul.f32 %v1630_v38, %v1630_v38  ;;  %v1666_v30 = vrot.slane %v2399_v12, %v1665_v29 }
 0xc65   :  { %v1631_v40 = vmul.f32 %v1629_v39, %v1629_v39 }
 0xc66   :  { %v1636_v7 = vsel %vm39_vm0, %v1632_v42, 0.0 }
 0xc67   :  { %v1633_v41 = vsel %vm39_vm0, %v1631_v40, 0.0 }
 0xc68   :  { %1634 = vadd.xlane.f32.xlu0 %v1633_v41 }
 0xc6c   :  { %1637 = vadd.xlane.f32.xlu0 %v1636_v7 }
 0xcf5   :  { %v1635_v53 = vpop.xlane.xlu0 %1634 }
 0xcf6   :  { %v1639_v54 = vmul.f32 0.03125, %v1635_v53 }
 0xcf8   :  { %v1641_v55 = vadd.f32 1e-12, %v1639_v54 }
 0xcf9   :  { %v1638_v56 = vpop.xlane.xlu0 %1637 }
 0xcfa   :  { %2266 = vrsqrt.f32 %v1641_v55  ;;  %v1640_v57 = vmul.f32 0.03125, %v1638_v56 }
 0xcfc   :  { %v1642_v58 = vadd.f32 1e-12, %v1640_v57 }
 0xcfe   :  { %2268 = vrsqrt.f32 %v1642_v58 }
 0xd04   :  { %v2267_v61 = vpop.eup %2266 }
 0xd05   :  { %v1645_v62 = vmul.f32 %v2267_v61, %v1629_v39 }
 0xd07   :  { %v1651_v0 = vmul.f32 %v1650_v60, %v1645_v62 }
 0xd08   :  { %v2269_v1 = vpop.eup %2268 }
 0xd09   :  { %v1646_v3 = vmul.f32 %v2269_v1, %v1630_v38  ;;  %v1657_v6 = vadd.f32 %v1656_v63, %v1651_v0  ;;  %v1884_v1 = vsub.s32 6, %v2389_v10 }
 0xd0b   :  { %v1652_v9 = vmul.f32 %v1650_v60, %v1646_v3  ;;  %2121 = vmatprep.mubr.msk.f32.mxu1 %vm39_vm0, %v1657_v6  ;;  %v1890_v3 = vsub.s32 7, %v2389_v10 }
 0xd0d   :  { %v1658_v11 = vadd.f32 %v1656_v63, %v1652_v9  ;;  %v1891_v14 = vrot.slane %v2399_v12, %v1890_v3 }
 0xd0f   :  { %2122 = vmatmul.mubr.msk.f32.vlgmr.msra.gmra.mrb[22].mxu1 %vm39_vm0, %v1658_v11 }
 0xde2   :  { %v2123_v32 = vpop.f32.mrb[22].mxu1 }
 0xde3   :  { %v1745_v4 = vadd.f32 %v2123_v32, %v1666_v30  ;;  %v1739_v33 = vpop.f32.mrb[23].mxu1 }
 0xde4   :  { %v1740_v34 = vadd.f32 %v1739_v33, %v1666_v30 }
 0xde5   :  { %v1752_v35 = vmul.f32 0.70710677, %v1745_v4  ;;  %v1749_v7 = vmul.f32 0.5, %v1745_v4 }
 0xde6   :  { %v1751_v36 = vmul.f32 0.70710677, %v1740_v34  ;;  %v1748_v41 = vmul.f32 0.5, %v1740_v34 }
 0xde7   :  { %2270 = verf.f32 %v1752_v35 }
 0xde8   :  { %2272 = verf.f32 %v1751_v36 }
 0xdf1   :  { %v2271_v38 = vpop.eup %2270 }
 0xdf2   :  { %v2273_v39 = vpop.eup %2272  ;;  %v1756_v40 = vadd.f32 1.0, %v2271_v38 }
 0xdf3   :  { %v1755_v42 = vadd.f32 1.0, %v2273_v39 }
 0xdf4   :  { %v1758_v43 = vmul.f32 %v1756_v40, %v1749_v7 }
 0xdf5   :  { %v1757_v5 = vmul.f32 %v1755_v42, %v1748_v41 }
 0xdf7   :  { %2156 = vmatprep.mubr.f32.mxu0 %v1757_v5 }
 0xdf8   :  { %2157 = vmatmul.mubr.f32.vlgmr.msra.gmra.mrb[14].mxu0 %v1758_v43 }
 0xecb   :  { %v2158_v44 = vpop.f32.mrb[14].mxu0 }
 0xecc   :  { %v1851_v45 = vadd.f32 %v2158_v44, %v1778_v31  ;;  %v1845_v37 = vpop.f32.mrb[15].mxu0 }
 0xecd   :  { %v1846_v46 = vadd.f32 %v1845_v37, %v1778_v31 }
 0xece   :  { %v1855_v48 = vadd.f32 %v1851_v45, %v1658_v11 }
 0xecf   :  { %v1854_v16 = vadd.f32 %v1846_v46, %v1657_v6  ;;  %v1885_v6 = vrot.slane %v2399_v12, %v1884_v1 }
 0xed0   :  { %v1859_v50 = vsel %vm39_vm0, %v1855_v48, 0.0 }
 0xed1   :  { %1860 = vadd.xlane.f32.xlu0 %v1859_v50  ;;  %v1856_v47 = vsel %vm39_vm0, %v1854_v16, 0.0 }
 0xed2   :  { %1857 = vadd.xlane.f32.xlu1 %v1856_v47 }
 0xf5e   :  { %v1861_v51 = vpop.xlane.xlu0 %1860 }
 0xf5f   :  { %v1863_v49 = vmul.f32 0.03125, %v1861_v51  ;;  %v1858_v52 = vpop.xlane.xlu1 %1857 }
 0xf60   :  { %v1862_v53 = vmul.f32 0.03125, %v1858_v52 }
 0xf61   :  { %v1865_v54 = vsub.f32 %v1855_v48, %v1863_v49 }
 0xf62   :  { %v1864_v55 = vsub.f32 %v1854_v16, %v1862_v53 }
 0xf63   :  { %v1867_v56 = vmul.f32 %v1865_v54, %v1865_v54 }
 0xf64   :  { %v1866_v57 = vmul.f32 %v1864_v55, %v1864_v55 }
 0xf65   :  { %v1871_v58 = vsel %vm39_vm0, %v1867_v56, 0.0 }
 0xf66   :  { %1872 = vadd.xlane.f32.xlu0 %v1871_v58  ;;  %v1868_v17 = vsel %vm39_vm0, %v1866_v57, 0.0 }
 0xf67   :  { %1869 = vadd.xlane.f32.xlu1 %v1868_v17 }
 0xff3   :  { %v1873_v59 = vpop.xlane.xlu0 %1872 }
 0xff4   :  { %v1875_v60 = vmul.f32 0.03125, %v1873_v59  ;;  %v1870_v61 = vpop.xlane.xlu1 %1869 }
 0xff5   :  { %v1874_v62 = vmul.f32 0.03125, %v1870_v61 }
 0xff6   :  { %v1877_v63 = vadd.f32 1e-12, %v1875_v60 }
 0xff7   :  { %v1876_v0 = vadd.f32 1e-12, %v1874_v62 }
 0xff8   :  { %2274 = vrsqrt.f32 %v1877_v63 }
 0xff9   :  { %2276 = vrsqrt.f32 %v1876_v0 }
0x1002   :  { %v2275_v9 = vpop.eup %2274 }
0x1003   :  { %v2277_v11 = vpop.eup %2276  ;;  %v1881_v13 = vmul.f32 %v2275_v9, %v1865_v54 }
0x1004   :  { %v1880_v15 = vmul.f32 %v2277_v11, %v1864_v55 }
0x1005   :  { %v1887_v18 = vmul.f32 %v1885_v6, %v1881_v13 }
0x1006   :  { %v1886_v19 = vmul.f32 %v1885_v6, %v1880_v15 }
0x1007   :  { %v1893_v20 = vadd.f32 %v1891_v14, %v1887_v18 }
0x1008   :  { %v1892_v21 = vadd.f32 %v1891_v14, %v1886_v19 }
0x1009   :  { %1895 = vst.msk [vmem:[#allocation2 + $0x8] sm:$0xff] %vm39_vm0, %v1893_v20 }
0x100a   :  { %1894 = vst.msk [vmem:[#allocation2] sm:$0xff] %vm39_vm0, %v1892_v21 }
0x100b   :  { %2289 = shalt.err (!%p2286_p4)
}
0x100c   :  { %s2290_s4 = scalar_lea.hbm %s2666_s7, 256 }
0x100d   :  { %p2291_p5 = scmp.ne.s32.totalorder %s2666_s7, %s2290_s4  ;;  %p2294_p6 = scmp.lt.u32.totalorder %s2290_s4, %s2666_s7 }
0x100f   :  { %p2296_p7 = pnand %p2294_p6, %p2291_p5 }
0x1011   :  { %2299 = shalt.err (!%p2296_p7)
}
0x1012   :  { %s2320_s28 = smov 128  }
0x1013   :  { %1907 = dma.vmem_to_hbm [thread:$0]  %s1902_s19, 256, %s2666_s7, [#allocation3], %s2320_s28, %s2320_s28, %s2316_s24  }
0x1014   :  { %2300 = dma.done.wait [#allocation3], 256  }
0x1015   :  { %2301 = vsyncadd [#allocation3], 4294967040 }
0x1016   :  { %1911 = vsyncpa [#allocation3], 1 }

</bundles_post_ra>
